<compile_context>
chip_gen: v7x
topology: tpu7x:2x2x1
jax: 0.10.0
libtpu: 0.0.40
codegen_flags: <defaults>
</compile_context>

<pallas_src>
import functools

import jax
import jax.numpy as jnp
from jax.experimental import pallas as pl
from jax.experimental.pallas import tpu as pltpu

EPS = 1e-16          # torch_geometric softmax denominator epsilon
_PAD_X = -1e30       # finite "minus infinity" for padded edge rows
_NEG_INF = float("-inf")


def _transpose_fe(x_ef, f):
    """[TE, F] -> [F, TE] via an identity contraction on the MXU (robust for F < 128)."""
    rows = jax.lax.broadcasted_iota(jnp.int32, (f, f), 0)
    cols = jax.lax.broadcasted_iota(jnp.int32, (f, f), 1)
    eye = (rows == cols).astype(jnp.float32)
    return jax.lax.dot_general(
        eye, x_ef, (((1,), (1,)), ((), ())),
        preferred_element_type=jnp.float32)


def _one_hot_mask(idx_row, num_nodes):
    """[1, TE] int32 group ids -> [N, TE] {0,1} float32 membership mask."""
    te = idx_row.shape[-1]
    node_ids = jax.lax.broadcasted_iota(jnp.int32, (num_nodes, te), 0)
    return (node_ids == idx_row).astype(jnp.float32)


def _reduce_kernel(idx_ref, x_ref, gsum_ref, m_ref, *, num_nodes):
    """Pass 1: online (rescaled) accumulation of m[F,1] and gsum[F,N] over E tiles."""
    @pl.when(pl.program_id(0) == 0)
    def _():
        gsum_ref[...] = jnp.zeros(gsum_ref.shape, jnp.float32)
        m_ref[...] = jnp.full(m_ref.shape, _NEG_INF, jnp.float32)

    f = x_ref.shape[1]
    x_fe = _transpose_fe(x_ref[...].astype(jnp.float32), f)        # [F, TE]
    maskf = _one_hot_mask(idx_ref[...], num_nodes)                  # [N, TE]

    m_old = m_ref[...]                                              # [F, 1]
    m_new = jnp.maximum(m_old, jnp.max(x_fe, axis=1, keepdims=True))
    ex = jnp.exp(x_fe - m_new)                                      # [F, TE]

    # Scatter-add of exp into per-node bins via the one-hot matmul: [F, N].
    part = jax.lax.dot_general(
        ex, maskf, (((1,), (1,)), ((), ())),
        preferred_element_type=jnp.float32)

    # exp(-inf - finite) == 0, so the first tile rescales the zero gsum by 0.
    gsum_ref[...] = gsum_ref[...] * jnp.exp(m_old - m_new) + part
    m_ref[...] = m_new


def _normalize_kernel(idx_ref, x_ref, gsum_ref, m_ref, o_ref, *, num_nodes):
    """Pass 2: gather the per-group denominator back to edges and normalise."""
    f = x_ref.shape[1]
    x_fe = _transpose_fe(x_ref[...].astype(jnp.float32), f)        # [F, TE]
    maskf = _one_hot_mask(idx_ref[...], num_nodes)                  # [N, TE]

    ex = jnp.exp(x_fe - m_ref[...])                                 # [F, TE]
    sum_pe = jax.lax.dot_general(                                   # [F, TE]
        gsum_ref[...], maskf, (((1,), (0,)), ((), ())),
        preferred_element_type=jnp.float32)

    denom = sum_pe + EPS
    r = pl.reciprocal(denom, approx=True)       # EUP slot, ~free next to exp
    r = r * (2.0 - denom * r)                   # one Newton step -> ~f32 accurate
    o_ref[...] = (ex * r).astype(o_ref.dtype)   # lane-dense [F, TE] stores


def _round_up(v, m):
    return (v + m - 1) // m * m


def _vmem_limit_bytes(te, f, n):
    per_tile = te * f + te + f * te              # double-buffered x / idx / out tiles
    resident = f * n + f                         # gsum + m
    interm = n * te + 3 * f * te + f * f         # mask, transposed x, ex, sum_pe, eye
    est = 4 * (2 * per_tile + resident + interm)
    return int(min(max(2 * est, 8 << 20), 64 << 20))


def edge_softmax(edge_attr, edge_index, num_nodes, *, tile_e=512,
                 transpose_output=True):
    """Scatter softmax of edge_attr[E, F] grouped by edge_index[0] (global ids).

    Assumes 0 <= edge_index[0, e] < num_nodes (PyG Batch invariant); out-of-range
    ids fall into no group (there is no runtime bounds check on TPU).
    Set transpose_output=False to get the lane-dense [F, E] layout directly and
    skip the final HBM round-trip transpose if the consumer can take it.
    """
    e, f = edge_attr.shape
    idx = edge_index[0].astype(jnp.int32)

    # Pad the edge axis to a multiple of the (>=128-lane) edge tile.
    e_pad = _round_up(max(e, 128), 128)
    te = min(tile_e, e_pad)
    e_pad = _round_up(e_pad, te)
    n_tiles = e_pad // te

    x = edge_attr
    if e_pad != e:
        x = jnp.pad(edge_attr, ((0, e_pad - e), (0, 0)), constant_values=_PAD_X)
        idx = jnp.pad(idx, (0, e_pad - e), constant_values=num_nodes)
    idx2d = idx.reshape(1, e_pad)

    vmem = _vmem_limit_bytes(te, f, num_nodes)

    # Pass 1: reduce over edge tiles into resident [F, N] / [F, 1] stats.
    gsum, m = pl.pallas_call(
        functools.partial(_reduce_kernel, num_nodes=num_nodes),
        out_shape=(jax.ShapeDtypeStruct((f, num_nodes), jnp.float32),
                   jax.ShapeDtypeStruct((f, 1), jnp.float32)),
        grid=(n_tiles,),
        in_specs=[pl.BlockSpec((1, te), lambda i: (0, i)),
                  pl.BlockSpec((te, f), lambda i: (i, 0))],
        out_specs=(pl.BlockSpec((f, num_nodes), lambda i: (0, 0)),
                   pl.BlockSpec((f, 1), lambda i: (0, 0))),
        compiler_params=pltpu.CompilerParams(
            dimension_semantics=("arbitrary",),
            vmem_limit_bytes=vmem),
    )(idx2d, x)

    # Pass 2: per-tile normalisation; edge tiles are independent.
    out_fe = pl.pallas_call(
        functools.partial(_normalize_kernel, num_nodes=num_nodes),
        out_shape=jax.ShapeDtypeStruct((f, e_pad), edge_attr.dtype),
        grid=(n_tiles,),
        in_specs=[pl.BlockSpec((1, te), lambda i: (0, i)),
                  pl.BlockSpec((te, f), lambda i: (i, 0)),
                  pl.BlockSpec((f, num_nodes), lambda i: (0, 0)),
                  pl.BlockSpec((f, 1), lambda i: (0, 0))],
        out_specs=pl.BlockSpec((f, te), lambda i: (0, i)),
        compiler_params=pltpu.CompilerParams(
            dimension_semantics=("parallel",),
            vmem_limit_bytes=vmem),
    )(idx2d, x, gsum, m)

    out_fe = out_fe[:, :e]
    return jnp.transpose(out_fe) if transpose_output else out_fe


def _reference_edge_softmax(edge_attr, edge_index, num_nodes):
    """Pure-JAX reference matching torch_geometric.utils.softmax."""
    idx = edge_index[0]
    gmax = jax.ops.segment_max(edge_attr, idx, num_segments=num_nodes)
    gmax = jnp.where(jnp.isfinite(gmax), gmax, 0.0)
    ex = jnp.exp(edge_attr - gmax[idx])
    gsum = jax.ops.segment_sum(ex, idx, num_segments=num_nodes)
    return ex / (gsum[idx] + EPS)


if __name__ == "__main__":
    key = jax.random.PRNGKey(0)
    k_attr, k_src, k_dst = jax.random.split(key, 3)

    # Synthetic "Batch": 2 graphs x 8 nodes x 96 edges, concatenated with
    # per-graph node-index offsets (exactly what PyG's Batch does).
    num_graphs, nodes_per_graph, edges_per_graph, feat = 2, 8, 96, 8
    num_nodes = num_graphs * nodes_per_graph
    num_edges = num_graphs * edges_per_graph        # 192 -> pads to 256

    src_local = jax.random.randint(
        k_src, (num_graphs, edges_per_graph), 0, nodes_per_graph)
    dst_local = jax.random.randint(
        k_dst, (num_graphs, edges_per_graph), 0, nodes_per_graph)
    offsets = (jnp.arange(num_graphs) * nodes_per_graph)[:, None]
    edge_index = jnp.stack(
        [(src_local + offsets).reshape(-1), (dst_local + offsets).reshape(-1)],
        axis=0).astype(jnp.int32)                   # [2, E]
    edge_attr = jax.random.normal(k_attr, (num_edges, feat), jnp.float32)

    # tile_e=128 exercises the multi-tile online reduction + padding path.
    out = edge_softmax(edge_attr, edge_index, num_nodes, tile_e=128)
    out = jax.block_until_ready(out)

    ref = _reference_edge_softmax(edge_attr, edge_index, num_nodes)
    assert out.shape == edge_attr.shape and out.dtype == edge_attr.dtype
    assert jnp.allclose(out, ref, atol=1e-5, rtol=1e-5)

    print("KERNEL_OK")
</pallas_src>

<mosaic_0001>
module attributes {stable_mosaic.version = 11 : i64} {
  func.func @_reduce_kernel(%arg0: i32, %arg1: memref<1x128xi32, #tpu.memory_space<vmem>>, %arg2: memref<128x8xf32, #tpu.memory_space<vmem>>, %arg3: memref<8x16xf32, #tpu.memory_space<vmem>>, %arg4: memref<8x1xf32, #tpu.memory_space<vmem>>) attributes {dimension_semantics = [#tpu.dimension_semantics<arbitrary>], iteration_bounds = array<i64: 2>, scalar_prefetch = 0 : i64, scratch_operands = 0 : i64, tpu.core_type = #tpu.core_type<tc>, window_params = [{transform_indices = @transform_0, window_bounds = array<i64: 1, 128>}, {transform_indices = @transform_1, window_bounds = array<i64: 128, 8>}, {pipeline_mode = #tpu.pipeline_mode<synchronous>, transform_indices = @transform_2, window_bounds = array<i64: 8, 16>}, {pipeline_mode = #tpu.pipeline_mode<synchronous>, transform_indices = @transform_3, window_bounds = array<i64: 8, 1>}]} {
    %c0_i32 = arith.constant 0 : i32
    %0 = arith.cmpi eq, %arg0, %c0_i32 : i32
    %1 = arith.extui %0 : i1 to i32
    %c0_i32_0 = arith.constant 0 : i32
    %2 = arith.cmpi ne, %1, %c0_i32_0 : i32
    scf.if %2 {
      %cst_14 = arith.constant 0.000000e+00 : f32
      %32 = vector.broadcast %cst_14 : f32 to vector<8x16xf32>
      %c0_15 = arith.constant 0 : index
      %c0_16 = arith.constant 0 : index
      %33 = vector.load %arg3[%c0_15, %c0_16] : memref<8x16xf32, #tpu.memory_space<vmem>>, vector<8x16xf32>
      tpu.vector_store %arg3[%c0_15, %c0_16], %32 {strides = array<i32>} : memref<8x16xf32, #tpu.memory_space<vmem>>, vector<8x16xf32>,
      %cst_17 = arith.constant 0xFF800000 : f32
      %34 = vector.broadcast %cst_17 : f32 to vector<8x1xf32>
      %c0_18 = arith.constant 0 : index
      %c0_19 = arith.constant 0 : index
      %35 = vector.load %arg4[%c0_18, %c0_19] : memref<8x1xf32, #tpu.memory_space<vmem>>, vector<8x1xf32>
      tpu.vector_store %arg4[%c0_18, %c0_19], %34 {strides = array<i32>} : memref<8x1xf32, #tpu.memory_space<vmem>>, vector<8x1xf32>,
    } else {
    }
    %c0 = arith.constant 0 : index
    %c0_1 = arith.constant 0 : index
    %3 = vector.load %arg2[%c0, %c0_1] : memref<128x8xf32, #tpu.memory_space<vmem>>, vector<128x8xf32>
    %4 = tpu.iota {dimensions = array<i32: 0>} : vector<8x8xi32>
    %5 = tpu.iota {dimensions = array<i32: 1>} : vector<8x8xi32>
    %6 = arith.cmpi eq, %4, %5 : vector<8x8xi32>
    %7 = arith.extui %6 : vector<8x8xi1> to vector<8x8xi32>
    %8 = arith.sitofp %7 : vector<8x8xi32> to vector<8x8xf32>
    %cst = arith.constant dense<0.000000e+00> : vector<8x128xf32>
    %9 = tpu.matmul %8, %3, %cst {dimension_numbers = #tpu.dot_dimension_numbers<[1], [1], [0], [0], [0, 0, 1, 0], [], []>} : vector<8x8xf32>, vector<128x8xf32>, vector<8x128xf32> -> vector<8x128xf32>
    %c0_2 = arith.constant 0 : index
    %c0_3 = arith.constant 0 : index
    %10 = vector.load %arg1[%c0_2, %c0_3] : memref<1x128xi32, #tpu.memory_space<vmem>>, vector<1x128xi32>
    %11 = tpu.iota {dimensions = array<i32: 0>} : vector<16x128xi32>
    %12 = vector.broadcast %10 : vector<1x128xi32> to vector<16x128xi32>
    %13 = arith.cmpi eq, %11, %12 : vector<16x128xi32>
    %14 = arith.extui %13 : vector<16x128xi1> to vector<16x128xi32>
    %15 = arith.sitofp %14 : vector<16x128xi32> to vector<16x128xf32>
    %c0_4 = arith.constant 0 : index
    %c0_5 = arith.constant 0 : index
    %16 = vector.load %arg4[%c0_4, %c0_5] : memref<8x1xf32, #tpu.memory_space<vmem>>, vector<8x1xf32>
    %cst_6 = arith.constant dense<0xFF800000> : vector<8xf32>
    %17 = vector.multi_reduction <maximumf>, %9, %cst_6 [1] : vector<8x128xf32> to vector<8xf32>
    %18 = vector.shape_cast %17 : vector<8xf32> to vector<8x1xf32>
    %19 = arith.maximumf %16, %18 : vector<8x1xf32>
    %20 = vector.broadcast %19 : vector<8x1xf32> to vector<8x128xf32>
    %21 = arith.subf %9, %20 : vector<8x128xf32>
    %22 = math.exp %21 : vector<8x128xf32>
    %cst_7 = arith.constant dense<0.000000e+00> : vector<8x16xf32>
    %23 = tpu.matmul %22, %15, %cst_7 {dimension_numbers = #tpu.dot_dimension_numbers<[1], [1], [0], [0], [0, 0, 1, 0], [], []>} : vector<8x128xf32>, vector<16x128xf32>, vector<8x16xf32> -> vector<8x16xf32>
    %c0_8 = arith.constant 0 : index
    %c0_9 = arith.constant 0 : index
    %24 = vector.load %arg3[%c0_8, %c0_9] : memref<8x16xf32, #tpu.memory_space<vmem>>, vector<8x16xf32>
    %25 = arith.subf %16, %19 : vector<8x1xf32>
    %26 = math.exp %25 : vector<8x1xf32>
    %27 = vector.broadcast %26 : vector<8x1xf32> to vector<8x16xf32>
    %28 = arith.mulf %24, %27 : vector<8x16xf32>
    %29 = arith.addf %28, %23 : vector<8x16xf32>
    %c0_10 = arith.constant 0 : index
    %c0_11 = arith.constant 0 : index
    %30 = vector.load %arg3[%c0_10, %c0_11] : memref<8x16xf32, #tpu.memory_space<vmem>>, vector<8x16xf32>
    tpu.vector_store %arg3[%c0_10, %c0_11], %29 {strides = array<i32>} : memref<8x16xf32, #tpu.memory_space<vmem>>, vector<8x16xf32>,
    %c0_12 = arith.constant 0 : index
    %c0_13 = arith.constant 0 : index
    %31 = vector.load %arg4[%c0_12, %c0_13] : memref<8x1xf32, #tpu.memory_space<vmem>>, vector<8x1xf32>
    tpu.vector_store %arg4[%c0_12, %c0_13], %19 {strides = array<i32>} : memref<8x1xf32, #tpu.memory_space<vmem>>, vector<8x1xf32>,
    return
  }
  func.func @transform_0(%arg0: i32) -> (i32, i32) {
    %c0_i32 = arith.constant 0 : i32
    %c0_i32_0 = arith.constant 0 : i32
    return %c0_i32, %arg0 : i32, i32
  }
  func.func @transform_1(%arg0: i32) -> (i32, i32) {
    %c0_i32 = arith.constant 0 : i32
    %c0_i32_0 = arith.constant 0 : i32
    return %arg0, %c0_i32 : i32, i32
  }
  func.func @transform_2(%arg0: i32) -> (i32, i32) {
    %c0_i32 = arith.constant 0 : i32
    %c0_i32_0 = arith.constant 0 : i32
    %c0_i32_1 = arith.constant 0 : i32
    return %c0_i32, %c0_i32_0 : i32, i32
  }
  func.func @transform_3(%arg0: i32) -> (i32, i32) {
    %c0_i32 = arith.constant 0 : i32
    %c0_i32_0 = arith.constant 0 : i32
    %c0_i32_1 = arith.constant 0 : i32
    return %c0_i32, %c0_i32_0 : i32, i32
  }
}

</mosaic_0001>

<bundles_post_ra>
// kernel: tpu_custom_call.1
= control target key start
LH: loop header
LB: loop body
LE: loop exit
PB: predicated region body
PF: predicated region fallthrough
CT: control target
= control target key end

     0   :  { %9 = vsyncpa [#allocation3], 0  ;;  %s719_s12 = smov 0   ;;  %s823_s0 = inlined_call_operand.vmem [shape: s32[1,256], index: 0, kind: input, shape index: {}]   ;;  %s824_s1 = inlined_call_operand.vmem [shape: f32[256,8], index: 1, kind: input, shape index: {}]   ;;  %s825_s2 = inlined_call_operand.hbm [shape: f32[8,16], index: 2, kind: output, shape index: {0}]   ;;  %s826_s3 = inlined_call_operand.vmem [shape: f32[8,1], index: 3, kind: output, shape index: {1}]  }
   0x1 LB: > { %s725_s13 = sadd.s32 4294967295, %s689_s12   ;;  %p497_p0 = scmp.ge.s32.totalorder %s689_s12, 1  ;;  %s689_s12 = sphi %s719_s12, %s15_s12  }
   0x2   : > { %p140_p1 = scmp.lt.s32.totalorder %s689_s12, 3 }
   0x4   : > { %p141_p2 = pnand %p497_p0, %p140_p1 }
   0x5   : > { %p162_p3 = scmp.lt.s32.totalorder (!%p141_p2), %s725_s13, 1  ;;  %s498_s14 = sshll.u32 (!%p141_p2), %s725_s13, 4 }
   0x6   : > { %144 = sbr.rel (%p141_p2) target bundleno = 815 (0x32f), region = 28  ;;  %p166_p4 = scmp.lt.s32.totalorder (!%p141_p2), %s498_s14, 31 }
   0x7   : > { %p500_p5 = scmp.ne.s32.totalorder (!%p141_p2), %s725_s13, 0 }
   0xd   : > { %s732_s15 = scalar_select %p162_p3, %s725_s13, 1 }
   0xe   : > { %s830_s14 = smov (!%p166_p4, %s498_s14), 31  ;;  %174 = sbr.rel (%p500_p5) target bundleno = 21 (0x15), region = 32 }
   0xf   : > { %s164_s18 = scalar_lea.vmem %s823_s0, %s732_s15  ;;  %s499_s19 = sshll.u32 %s830_s14, 3  ;;  %vm175_vm0 = vcmask (!%p500_p5), 130048   ;;  %vm177_vm1 = vcmask (!%p500_p5), 7168   ;;  %v691_v0 = vmov (!%p500_p5), 0.0   ;;  %v692_v1 = vmov (!%p500_p5), -inf  }
  0x10   : > { %s741_s22 = scalar_lea.vmem %s824_s1, %s499_s19  ;;  %176 = vst.msk [vmem:[#allocation2] sm:$0xff] (!%p500_p5), %vm175_vm0, %v691_v0 }
  0x11   : > { %178 = vst.msk [vmem:[%s826_s3] sm:$0xff] (!%p500_p5), %vm177_vm1, %v692_v1 }
  0x15 PF: > { %v179_v2 = vld [vmem:[%s741_s22] sm:$0xff]  ;;  %v180_v3 = vld [vmem:[%s741_s22 + $0x8] sm:$0xff]  ;;  %vm202_vm2 = vcmask 64512   ;;  %v693_v4 = vmov 0.0|0.0   ;;  %vm694_vm4 = vmmov 0   ;;  %v695_v7 = vmov 0.0  }
  0x16   : > { %590 = vmatprep.subr.bf16.mxu0 %v693_v4  ;;  %v591_v5 = vpack.c.bf16 %v180_v3, %v179_v2  ;;  %vm751_vm3 = vmpackc.low %vm202_vm2, %vm202_vm2  ;;  %622 = vmatprep.subr.bf16.mxu1 %v693_v4  ;;  %v181_v8 = vld [vmem:[%s741_s22 + $0x10] sm:$0xff]  ;;  %v182_v9 = vld [vmem:[%s741_s22 + $0x18] sm:$0xff]  ;;  %v195_v28 = vlaneseq  ;;  %v696_v35 = vmov 0   ;;  %vm431_vm6 = vcmask 7168   ;;  %s698_s4 = smov [#allocation2]   ;;  %p629_p6 = scmp.eq.s32.totalorder %s725_s13, 1 }
  0x17   : > { %580 = vmatprep.mubr.msk.f32.mxu0 %vm694_vm4, %v695_v7  ;;  %587 = vmatprep.mubr.msk.f32.mxu1 %vm694_vm4, %v695_v7  ;;  %v595_v10 = vpack.c.bf16 %v182_v9, %v181_v8  ;;  %v183_v11 = vld [vmem:[%s741_s22 + $0x20] sm:$0xff]  ;;  %v184_v12 = vld [vmem:[%s741_s22 + $0x28] sm:$0xff]  ;;  %v185_v14 = vld [vmem:[%s741_s22 + $0x30] sm:$0xff]  ;;  %v697_v43 = vmov 1.0|1.0   ;;  %s440_s5 = sshll.u32 %s698_s4, 4  ;;  %s441_s5 = int_to_ptr.vmem [resolvable:$true] %s440_s5 }
  0x18   : > { %593 = vmatpush3.bf16.xpose.msk.msra.mxu0 %vm751_vm3, %v591_v5  ;;  %v599_v13 = vpack.c.bf16 %v184_v12, %v183_v11  ;;  %v186_v15 = vld [vmem:[%s741_s22 + $0x38] sm:$0xff]  ;;  %v187_v17 = vld [vmem:[%s741_s22 + $0x40] sm:$0xff]  ;;  %v188_v18 = vld [vmem:[%s741_s22 + $0x48] sm:$0xff]  ;;  %v196_v30 = vshrl.u32 %v195_v28, 7  ;;  %v198_v31 = vand.u32 127, %v195_v28  ;;  %647 = vset.pattern.permute.xlu0 %v696_v35  ;;  %vm429_vm10 = vcmask 130048   ;;  %p660_p10 = scmp.lt.s32.totalorder %s441_s5, %s441_s5 }
  0x19   : > { %594 = vmatprep.subr.bf16.mxu0 %v693_v4  ;;  %v603_v16 = vpack.c.bf16 %v186_v15, %v185_v14  ;;  %v607_v19 = vpack.c.bf16 %v188_v18, %v187_v17  ;;  %v189_v20 = vld [vmem:[%s741_s22 + $0x50] sm:$0xff]  ;;  %v190_v21 = vld [vmem:[%s741_s22 + $0x58] sm:$0xff]  ;;  %v191_v23 = vld [vmem:[%s741_s22 + $0x60] sm:$0xff]  ;;  %648 = vset.pattern.permute.xlu1 %v696_v35  ;;  %s653_s6 = scalar_lea.vmem %s441_s5, 128 }
  0x1a   : > { %v611_v22 = vpack.c.bf16 %v190_v21, %v189_v20  ;;  %v192_v24 = vld [vmem:[%s741_s22 + $0x68] sm:$0xff]  ;;  %v193_v26 = vld [vmem:[%s741_s22 + $0x70] sm:$0xff]  ;;  %v194_v27 = vld [vmem:[%s741_s22 + $0x78] sm:$0xff]  ;;  %vm199_vm5 = vcmp.eq.s32.totalorder %v196_v30, %v198_v31  ;;  %v325_v42 = vadd.s32 8, %v196_v30  ;;  %p654_p7 = scmp.ne.s32.totalorder %s441_s5, %s653_s6  ;;  %p661_p11 = scmp.lt.s32.totalorder %s653_s6, %s653_s6 }
  0x1b   : > { %v615_v25 = vpack.c.bf16 %v192_v24, %v191_v23  ;;  %v619_v29 = vpack.c.bf16 %v194_v27, %v193_v26  ;;  %v501_v32 = vsel %vm199_vm5, 1.0, %v695_v7  ;;  %v336_v36 = vld [vmem:[%s826_s3] sm:$0xff] }
  0x1c   : > { %v519_v41 = vld [vmem:[%s164_s18] ss:$0 sm:$0xff]  ;;  %p655_p8 = pnand %p654_p7, %p629_p6  ;;  %p662_p12 = por %p661_p11, %p660_p10 }
  0x1d   : > { %vm330_vm7 = vcmp.eq.s32.totalorder %v196_v30, %v519_v41  ;;  %vm331_vm8 = vcmp.eq.s32.totalorder %v325_v42, %v519_v41  ;;  %v418_v49 = vld [vmem:[#allocation2] sm:$0xff] }
  0x1e   : > { %vm623_vm9 = vmpackc.low %vm331_vm8, %vm330_vm7  ;;  %p656_p9 = pneg %p655_p8 }
  0x1f   : > { %624 = vmatpush3.bf16.xpose.msk.msra.mxu1 %vm623_vm9, %v697_v43 }
  0x20   : > { %597 = vmatpush3.bf16.xpose.msk.msra.mxu0 %vm751_vm3, %v595_v10  ;;  %p663_p13 = pnand %p662_p12, %p656_p9 }
  0x21   : > { %598 = vmatprep.subr.bf16.mxu0 %v693_v4 }
  0x28   : > { %601 = vmatpush3.bf16.xpose.msk.msra.mxu0 %vm751_vm3, %v599_v13 }
  0x29   : > { %602 = vmatprep.subr.bf16.mxu0 %v693_v4 }
  0x30   : > { %605 = vmatpush3.bf16.xpose.msk.msra.mxu0 %vm751_vm3, %v603_v16 }
  0x31   : > { %606 = vmatprep.subr.bf16.mxu0 %v693_v4 }
  0x38   : > { %609 = vmatpush3.bf16.xpose.msk.msra.mxu0 %vm751_vm3, %v607_v19 }
  0x39   : > { %610 = vmatprep.subr.bf16.mxu0 %v693_v4 }
  0x40   : > { %613 = vmatpush3.bf16.xpose.msk.msra.mxu0 %vm751_vm3, %v611_v22 }
  0x41   : > { %614 = vmatprep.subr.bf16.mxu0 %v693_v4 }
  0x48   : > { %617 = vmatpush3.bf16.xpose.msk.msra.mxu0 %vm751_vm3, %v615_v25 }
  0x49   : > { %618 = vmatprep.subr.bf16.mxu0 %v693_v4 }
  0x50   : > { %621 = vmatpush3.bf16.xpose.msk.msra.mxu0 %vm751_vm3, %v619_v29 }
  0x57   : > { %581 = vmatmul.mubr.msk.f32.vlgmr.msra.gmra.mrb[0].mxu0 %vm202_vm2, %v501_v32 }
 0x12a   : > { %v320_v33 = vpop.f32.mrb[0].mxu0 }
 0x12b   : > { %337 = vmax.xlane.f32.xlu0 %v320_v33  ;;  %v582_v34 = vpop.f32.mrb[1].mxu0 }
 0x1b8   : > { %v338_v37 = vpop.xlane.xlu0 %337 }
 0x1b9   : > { %v339_v38 = vmax.f32 %v336_v36, %v338_v37 }
 0x1bb   : > { %v419_v39 = vsub.f32 %v336_v36, %v339_v38  ;;  %432 = vst.msk [vmem:[%s826_s3] sm:$0xff] %vm431_vm6, %v339_v38  ;;  %342 = vperm.xlu0 %647, %v339_v38  }
 0x1bd   : > { %v420_v40 = vmul.f32 1.442695, %v419_v39 }
 0x1bf   : > { %649 = vpow2.f32 %v420_v40 }
 0x1c9   : > { %v650_v44 = vpop.eup %649 }
 0x1ca   : > { %424 = vperm.xlu1 %648, %v650_v44  }
 0x23a   : > { %v343_v45 = vpop.permute.xlu0 %342 }
 0x23b   : > { %v345_v46 = vsub.f32 %v320_v33, %v343_v45 }
 0x23d   : > { %v346_v47 = vmul.f32 1.442695, %v345_v46 }
 0x23f   : > { %651 = vpow2.f32 %v346_v47 }
 0x249   : > { %v652_v48 = vpop.eup %651  ;;  %v425_v50 = vpop.permute.xlu1 %424 }
 0x24a   : > { %588 = vmatmul.mubr.f32.vlgmr.msra.gmra.mrb[0].mxu1 %v652_v48  ;;  %v427_v51 = vmul.f32 %v425_v50, %v418_v49 }
 0x31d   : > { %v414_v52 = vpop.f32.mrb[0].mxu1 }
 0x31e   : > { %v428_v53 = vadd.f32 %v427_v51, %v414_v52  ;;  %v589_v54 = vpop.f32.mrb[1].mxu1 }
 0x320   : > { %430 = vst.msk [vmem:[#allocation2] sm:$0xff] %vm429_vm10, %v428_v53 }
 0x321   : > { %666 = shalt.err (!%p663_p13)
}
 0x322   : > { %s667_s9 = scalar_lea.hbm %s825_s2, 128 }
 0x323   : > { %p668_p0 = scmp.ne.s32.totalorder %s825_s2, %s667_s9  ;;  %p673_p3 = scmp.lt.u32.totalorder %s667_s9, %s825_s2 }
 0x325   : > { %p669_p1 = pnand %p668_p0, %p629_p6 }
 0x327   : > { %p670_p2 = pneg %p669_p1 }
 0x329   : > { %p675_p4 = pnand %p673_p3, %p670_p2 }
 0x32b   : > { %678 = shalt.err (!%p675_p4)
}
 0x32c   : > { %626 = dma.vmem_to_hbm [thread:$0]  (%p629_p6), %s441_s5, 128, %s825_s2, [#allocation3]  }
 0x32d   : > { %684 = dma.done.wait (%p629_p6), [#allocation3], 128  }
 0x32e   : > { %686 = vsyncadd (%p629_p6), [#allocation3], 4294967168 }
 0x32f PF: > { %s15_s12 = sadd.s32 1, %s689_s12  }
 0x330   : > { %p12_p5 = scmp.ge.s32.totalorder %s15_s12, 4  }
 0x332   :  { %14 = sbr.rel (!%p12_p5) target bundleno = 1 (0x1), region = 70 }
 0x339   :  { %459 = vsyncpa [#allocation3], 1 }
 0x33a   :  { %461 = vsyncpa [#allocation3 + $0x1], 1 }

</bundles_post_ra>
